<compile_context>
chip_gen: v5e
topology: v5e:2x2
jax: 0.10.0
libtpu: 0.0.40
codegen_flags: <defaults>
</compile_context>

<pallas_src>
import math
from functools import partial

import jax
import jax.numpy as jnp
from jax.experimental import pallas as pl
from jax.experimental.pallas import tpu as pltpu


# --------------------------------- kernel ------------------------------------

def layernorm_kernel(x_ref, w_ref, b_ref, o_ref, *, eps, dim):
    """LayerNorm over the last dim of a (rows, D) tile. f32 compute, native I/O."""
    x = x_ref[...].astype(jnp.float32)                    # (rows, D)
    mean = jnp.mean(x, axis=-1, keepdims=True)
    xc = x - mean
    # torch.std default is the unbiased estimator (Bessel, divide by D-1).
    var = jnp.sum(xc * xc, axis=-1, keepdims=True) * (1.0 / (dim - 1))
    denom = jnp.sqrt(var) + eps
    # EUP vrcp (its own bundle slot) + one Newton step to recover f32 precision.
    inv = pl.reciprocal(denom, approx=True)
    inv = inv * (2.0 - denom * inv)
    o_ref[...] = (w_ref[...] * (xc * inv) + b_ref[...]).astype(o_ref.dtype)


# -------------------------------- wrapper ------------------------------------

def _row_align(itemsize):
    # Sublane packing: 8 rows for 32-bit, 16 for bf16/f16, 32 for int8/fp8.
    return max(8, 32 // max(1, itemsize))


def _pick_row_block(n_rows, d, itemsize):
    """Row tile: ~4 MiB f32 compute footprint, dtype-aligned, >=2 grid steps."""
    align = _row_align(itemsize)
    if n_rows <= align:
        return n_rows                                     # full extent: always legal
    target_elems = (4 * 1024 * 1024) // 4                 # ~4 MiB of f32 per tile
    block = max(align, min(n_rows, target_elems // max(1, d)))
    # Keep >= 2 grid steps so v7x megacore split + double-buffering engage.
    if n_rows >= 2 * align:
        block = min(block, n_rows // 2)
    return max(align, (block // align) * align)


def _vmem_limit_bytes(block_rows, d, io_itemsize):
    """Footprint-sized VMEM limit (portable; never requests v7x's full 64 MiB)."""
    io_blk = block_rows * d * io_itemsize                 # one in/out block
    f32_tmp = block_rows * d * 4                          # f32 compute temporaries
    wb = 2 * 2 * d * 4                                    # weight + bias, double-buffered
    need = 2 * io_blk + 2 * io_blk + 2 * f32_tmp + wb     # double-buffered in + out + temps
    need = int(need * 1.25) + (2 << 20)                   # headroom for Mosaic scratch
    return min(need, 48 * 1024 * 1024)


def layernorm(x, weight, bias, eps=1e-5):
    """weight * (x - mean) / (std + eps) + bias over the last dim of x."""
    orig_shape = x.shape
    orig_dtype = x.dtype
    d = orig_shape[-1]
    n = math.prod(orig_shape[:-1])

    # I/O stays in the caller's dtype; only weight/bias (tiny) are pre-cast.
    x2 = x.reshape(n, d)
    w2 = weight.reshape(1, d).astype(jnp.float32)
    b2 = bias.reshape(1, d).astype(jnp.float32)

    io_itemsize = jnp.dtype(orig_dtype).itemsize
    block_rows = _pick_row_block(n, d, io_itemsize)
    grid = (pl.cdiv(n, block_rows),)                      # partial last tile is clipped

    # D is carried whole (reduction dim) so the blocks are always legal; for D
    # a multiple of 128 the stores are lane-dense.
    # TODO(synk): pad + mask the lane dim for D not a multiple of 128 to avoid
    # masked partial stores.
    out = pl.pallas_call(
        partial(layernorm_kernel, eps=float(eps), dim=d),
        out_shape=jax.ShapeDtypeStruct((n, d), orig_dtype),
        grid_spec=pltpu.PrefetchScalarGridSpec(
            num_scalar_prefetch=0,
            grid=grid,
            in_specs=[
                pl.BlockSpec((block_rows, d), lambda i: (i, 0)),   # activations, tiled
                pl.BlockSpec((1, d), lambda i: (0, 0)),            # weight (resident)
                pl.BlockSpec((1, d), lambda i: (0, 0)),            # bias   (resident)
            ],
            out_specs=pl.BlockSpec((block_rows, d), lambda i: (i, 0)),
        ),
        compiler_params=pltpu.CompilerParams(
            dimension_semantics=("parallel",),            # v7x: shard row tiles across TCs
            vmem_limit_bytes=_vmem_limit_bytes(block_rows, d, io_itemsize),
        ),
    )(x2, w2, b2)

    return out.reshape(orig_shape)


# ---------------------------- pure-JAX reference ------------------------------

def reference_layernorm(x, weight, bias, eps=1e-5):
    x32 = x.astype(jnp.float32)
    d = x32.shape[-1]
    mean = jnp.mean(x32, axis=-1, keepdims=True)
    var = jnp.sum((x32 - mean) ** 2, axis=-1, keepdims=True) / (d - 1)   # unbiased
    std = jnp.sqrt(var)
    w = weight.astype(jnp.float32)
    b = bias.astype(jnp.float32)
    return w * (x32 - mean) / (std + eps) + b


# ----------------------------------- main -------------------------------------

if __name__ == "__main__":
    # Small (8,128)-aligned shapes: 2*64 = 128 rows, D = 128 lanes -> 2 grid steps.
    B, T, D = 2, 64, 128

    key = jax.random.PRNGKey(0)
    kx, kw, kb = jax.random.split(key, 3)
    x = jax.random.normal(kx, (B, T, D), jnp.float32)
    weight = 1.0 + 0.1 * jax.random.normal(kw, (D,), jnp.float32)
    bias = 0.1 * jax.random.normal(kb, (D,), jnp.float32)

    # f32 path.
    out = jax.block_until_ready(layernorm(x, weight, bias, eps=1e-5))
    assert out.shape == (B, T, D), out.shape
    assert out.dtype == jnp.float32, out.dtype
    ref = reference_layernorm(x, weight, bias, eps=1e-5)
    max_err = float(jnp.max(jnp.abs(out - ref)))
    assert jnp.allclose(out, ref, atol=1e-4, rtol=1e-4), f"f32 max_err={max_err}"

    # bf16 path: native bf16 I/O through the kernel, f32 compute inside.
    x_bf16 = x.astype(jnp.bfloat16)
    out_bf16 = jax.block_until_ready(layernorm(x_bf16, weight, bias, eps=1e-5))
    assert out_bf16.shape == (B, T, D), out_bf16.shape
    assert out_bf16.dtype == jnp.bfloat16, out_bf16.dtype
    ref_bf16 = reference_layernorm(x_bf16, weight, bias, eps=1e-5)
    max_err_bf16 = float(jnp.max(jnp.abs(out_bf16.astype(jnp.float32) - ref_bf16)))
    assert max_err_bf16 < 5e-2, f"bf16 max_err={max_err_bf16}"

    print("KERNEL_OK")
</pallas_src>

<mosaic_0001>
module attributes {stable_mosaic.version = 11 : i64} {
  func.func @layernorm_kernel(%arg0: i32, %arg1: memref<64x128xf32, #tpu.memory_space<vmem>>, %arg2: memref<1x128xf32, #tpu.memory_space<vmem>>, %arg3: memref<1x128xf32, #tpu.memory_space<vmem>>, %arg4: memref<64x128xf32, #tpu.memory_space<vmem>>) attributes {dimension_semantics = [#tpu.dimension_semantics<parallel>], iteration_bounds = array<i64: 2>, scalar_prefetch = 0 : i64, scratch_operands = 0 : i64, tpu.core_type = #tpu.core_type<tc>, window_params = [{transform_indices = @transform_0, window_bounds = array<i64: 64, 128>}, {pipeline_mode = #tpu.pipeline_mode<synchronous>, transform_indices = @transform_1, window_bounds = array<i64: 1, 128>}, {pipeline_mode = #tpu.pipeline_mode<synchronous>, transform_indices = @transform_2, window_bounds = array<i64: 1, 128>}, {transform_indices = @transform_3, window_bounds = array<i64: 64, 128>}]} {
    %c0 = arith.constant 0 : index
    %c0_0 = arith.constant 0 : index
    %0 = vector.load %arg1[%c0, %c0_0] : memref<64x128xf32, #tpu.memory_space<vmem>>, vector<64x128xf32>
    %cst = arith.constant dense<0.000000e+00> : vector<64xf32>
    %1 = vector.multi_reduction <add>, %0, %cst [1] : vector<64x128xf32> to vector<64xf32>
    %2 = vector.shape_cast %1 : vector<64xf32> to vector<64x1xf32>
    %cst_1 = arith.constant 1.280000e+02 : f32
    %3 = vector.broadcast %cst_1 : f32 to vector<64x1xf32>
    %4 = arith.divf %2, %3 : vector<64x1xf32>
    %5 = vector.broadcast %4 : vector<64x1xf32> to vector<64x128xf32>
    %6 = arith.subf %0, %5 : vector<64x128xf32>
    %7 = arith.mulf %6, %6 : vector<64x128xf32>
    %cst_2 = arith.constant dense<0.000000e+00> : vector<64xf32>
    %8 = vector.multi_reduction <add>, %7, %cst_2 [1] : vector<64x128xf32> to vector<64xf32>
    %9 = vector.shape_cast %8 : vector<64xf32> to vector<64x1xf32>
    %cst_3 = arith.constant 0.00787401571 : f32
    %10 = vector.broadcast %cst_3 : f32 to vector<64x1xf32>
    %11 = arith.mulf %9, %10 : vector<64x1xf32>
    %12 = math.sqrt %11 : vector<64x1xf32>
    %cst_4 = arith.constant 9.99999974E-6 : f32
    %13 = vector.broadcast %cst_4 : f32 to vector<64x1xf32>
    %14 = arith.addf %12, %13 : vector<64x1xf32>
    %15 = tpu.reciprocal %14 {approx = true} : vector<64x1xf32> -> vector<64x1xf32>
    %16 = arith.mulf %14, %15 : vector<64x1xf32>
    %cst_5 = arith.constant 2.000000e+00 : f32
    %17 = vector.broadcast %cst_5 : f32 to vector<64x1xf32>
    %18 = arith.subf %17, %16 : vector<64x1xf32>
    %19 = arith.mulf %15, %18 : vector<64x1xf32>
    %c0_6 = arith.constant 0 : index
    %c0_7 = arith.constant 0 : index
    %20 = vector.load %arg2[%c0_6, %c0_7] : memref<1x128xf32, #tpu.memory_space<vmem>>, vector<1x128xf32>
    %21 = vector.broadcast %19 : vector<64x1xf32> to vector<64x128xf32>
    %22 = arith.mulf %6, %21 : vector<64x128xf32>
    %23 = vector.broadcast %20 : vector<1x128xf32> to vector<64x128xf32>
    %24 = arith.mulf %23, %22 : vector<64x128xf32>
    %c0_8 = arith.constant 0 : index
    %c0_9 = arith.constant 0 : index
    %25 = vector.load %arg3[%c0_8, %c0_9] : memref<1x128xf32, #tpu.memory_space<vmem>>, vector<1x128xf32>
    %26 = vector.broadcast %25 : vector<1x128xf32> to vector<64x128xf32>
    %27 = arith.addf %24, %26 : vector<64x128xf32>
    %c0_10 = arith.constant 0 : index
    %c0_11 = arith.constant 0 : index
    %28 = vector.load %arg4[%c0_10, %c0_11] : memref<64x128xf32, #tpu.memory_space<vmem>>, vector<64x128xf32>
    tpu.vector_store %arg4[%c0_10, %c0_11], %27 {strides = array<i32>} : memref<64x128xf32, #tpu.memory_space<vmem>>, vector<64x128xf32>,
    return
  }
  func.func @transform_0(%arg0: i32) -> (i32, i32) {
    %c0_i32 = arith.constant 0 : i32
    %c0_i32_0 = arith.constant 0 : i32
    return %arg0, %c0_i32 : i32, i32
  }
  func.func @transform_1(%arg0: i32) -> (i32, i32) {
    %c0_i32 = arith.constant 0 : i32
    %c0_i32_0 = arith.constant 0 : i32
    %c0_i32_1 = arith.constant 0 : i32
    return %c0_i32, %c0_i32_0 : i32, i32
  }
  func.func @transform_2(%arg0: i32) -> (i32, i32) {
    %c0_i32 = arith.constant 0 : i32
    %c0_i32_0 = arith.constant 0 : i32
    %c0_i32_1 = arith.constant 0 : i32
    return %c0_i32, %c0_i32_0 : i32, i32
  }
  func.func @transform_3(%arg0: i32) -> (i32, i32) {
    %c0_i32 = arith.constant 0 : i32
    %c0_i32_0 = arith.constant 0 : i32
    return %arg0, %c0_i32 : i32, i32
  }
}

</mosaic_0001>

<bundles_post_ra>
// kernel: tpu_custom_call.1
= control target key start
LH: loop header
LB: loop body
LE: loop exit
PB: predicated region body
PF: predicated region fallthrough
CT: control target
= control target key end

     0   :  { %8 = vsyncpa [#allocation3], 0  ;;  %s1123_s0 = inlined_call_operand.hbm [shape: f32[128,128], index: 0, kind: input, shape index: {}]   ;;  %s1124_s1 = inlined_call_operand.hbm [shape: f32[1,128], index: 1, kind: input, shape index: {}]   ;;  %s1125_s2 = inlined_call_operand.vmem [shape: f32[1,128], index: 2, kind: input, shape index: {}]   ;;  %s1126_s3 = inlined_call_operand.hbm [shape: f32[128,128], index: 3, kind: output, shape index: {}]  }
   0x1   :  { %10 = vsyncpa [#allocation3 + $0x1], 0 }
   0x2   :  { %11 = vsyncpa [#allocation6], 0 }
   0x3   :  { %12 = vsyncpa [#allocation4], 0 }
   0x4   :  { %14 = vsyncpa [#allocation4 + $0x1], 0  ;;  %s836_s12 = smov 0   ;;  %s838_s13 = smov 0  }
   0x5   :  { %s840_s14 = smov 0   ;;  %s842_s15 = smov 0  }
   0x6 LB: > { %s857_s16 = sadd.s32 4294967295, %s808_s15   ;;  %s562_s17 = sadd.s32 4294967294, %s808_s15   ;;  %s808_s15 = sphi %s842_s15, %s1137_s15   ;;  %s804_s14 = sphi %s840_s14, %s1136_s14   ;;  %s800_s13 = sphi %s838_s13, %s1135_s13   ;;  %s796_s12 = sphi %s836_s12, %s1134_s12  }
   0x7   : > { %s861_s18 = sadd.s32 1, %s808_s15   ;;  %s27_s19 = sadd.s32 1, %s804_s14 }
   0x8   : > { %s24_s20 = ssub.s32 %s808_s15, %s861_s18  ;;  %p34_p0 = scmp.ne.s32.totalorder %s804_s14, %s800_s13 }
   0x9   : > { %p25_p1 = scmp.eq.s32.totalorder %s24_s20, 0  ;;  %p35_p2 = scmp.eq.s32.totalorder %s808_s15, 0 }
   0xa   : > { %p40_p3 = scmp.ne.s32.totalorder %s800_s13, %s796_s12  ;;  %p41_p4 = scmp.eq.s32.totalorder %s857_s16, 0 }
   0xb   : > { %s873_s21 = scalar_select %p25_p1, %s804_s14, %s27_s19  }
   0xc   : > { %p875_p5 = por %p35_p2, %p34_p0  ;;  %p881_p6 = por %p41_p4, %p40_p3 }
   0xd   : > { %p106_p7 = scmp.eq.s32.totalorder %s857_s16, 1  ;;  %p112_p8 = scmp.eq.s32.totalorder %s562_s17, 1 }
   0xe   : > { %p563_p9 = scmp.ge.s32.totalorder %s808_s15, 1  ;;  %p119_p10 = scmp.lt.s32.totalorder %s808_s15, 3 }
   0xf   : > { %p888_p11 = por %p106_p7, %p34_p0  ;;  %p892_p12 = por %p112_p8, %p40_p3 }
  0x10   : > { %p896_p13 = pnand %p563_p9, %p119_p10  ;;  %s131_s29 = sshll.u32 %s1124_s1, 4  ;;  %s132_s29 = int_to_ptr.hbm [resolvable:$true] %s131_s29 }
  0x11   : > { %s810_s30 = smov [#allocation5]   ;;  %p601_p3 = scmp.lt.s32.totalorder %s808_s15, 2 }
  0x12   : > { %p588_p1 = pneg %p896_p13  ;;  %s133_s4 = sshll.u32 %s810_s30, 4  ;;  %s134_s4 = int_to_ptr.vmem [resolvable:$true] %s133_s4 }
  0x13   : > { %s147_s5 = sand.u32 1, %s804_s14   ;;  %p912_p7 = pnand %p601_p3, %p875_p5 }
  0x14   : > { %p589_p2 = pnand %p588_p1, %p41_p4  ;;  %s566_s7 = sshll.u32 %s147_s5, 6 }
  0x15   : > { %s578_s8 = sshll.u32 %s808_s15, 6  ;;  %s151_s19 = scalar_lea.vmem [#allocation2], %s566_s7 }
  0x16   : > { %591 = dma.hbm_to_vmem [thread:$0]  (!%p589_p2), %s132_s29, 16, %s134_s4, [#allocation6]  }
  0x17   : > { %s156_s11 = scalar_lea.hbm %s1123_s0, %s578_s8  ;;  %s159_s20 = sshll.u32 %s151_s19, 4  ;;  %s160_s20 = int_to_ptr.vmem [resolvable:$true] %s159_s20 }
  0x18   : > { %s157_s17 = sshll.u32 %s156_s11, 4  ;;  %s148_s27 = scalar_lea.sflag [#allocation3], %s147_s5  ;;  %s158_s17 = int_to_ptr.hbm [resolvable:$true] %s157_s17 }
  0x19   : > { %s708_s28 = sshra.s32 %s158_s17, 4  ;;  %p712_p8 = pneg %p912_p7  ;;  %s709_s28 = int_to_ptr.hbm [resolvable:$true] %s708_s28 }
  0x1a   : > { %s710_s22 = scalar_lea.hbm %s709_s28, 64  ;;  %s715_s4 = scalar_lea.hbm %s1123_s0, 128 }
  0x1b   : > { %p711_p5 = scmp.ne.s32.totalorder %s709_s28, %s710_s22  ;;  %p716_p1 = scmp.lt.s32.totalorder %s709_s28, %s1123_s0 }
  0x1c   : > { %p717_p2 = scmp.lt.s32.totalorder %s715_s4, %s710_s22 }
  0x1d   : > { %p713_p9 = pnand %p712_p8, %p711_p5 }
  0x1e   : > { %p718_p3 = por %p717_p2, %p716_p1 }
  0x1f   : > { %p714_p10 = pneg %p713_p9 }
  0x21   : > { %p719_p0 = pnand %p718_p3, %p714_p10 }
  0x23   : > { %722 = shalt.err (!%p719_p0)
}
  0x24   : > { %s811_s5 = smov 128   ;;  %s812_s7 = smov 8  }
  0x25   : > { %595 = dma.hbm_to_vmem [thread:$0]  (!%p912_p7), %s158_s17, 1024, %s160_s20, %s148_s27, %s811_s5, %s811_s5, %s812_s7  }
  0x26   : > { %171 = sbr.rel (%p896_p13) target bundleno = 359 (0x167), region = 32  ;;  %s933_s10 = sand.u32 (!%p896_p13), 1, %s800_s13  }
  0x27   : > { %s570_s11 = sshll.u32 (!%p896_p13), %s933_s10, 6  ;;  %s174_s19 = scalar_lea.sflag (!%p896_p13), [#allocation3], %s933_s10 }
  0x28   : > { %s177_s28 = scalar_lea.vmem (!%p896_p13), [#allocation2], %s570_s11 }
  0x2b   : > { %783 = dma.done.wait (%p881_p6), %s174_s19, 1024  }
  0x2c   : > { %785 = vsyncadd (%p881_p6), %s174_s19, 4294966272 }
  0x2d   : > { %787 = dma.done.wait (%p41_p4), [#allocation6], 16  }
  0x2e   : > { %789 = vsyncadd (%p41_p4), [#allocation6], 4294967280  ;;  %v212_v0 = vld [vmem:[%s177_s28 + $0x20] sm:$0xff]  ;;  %v210_v1 = vld [vmem:[%s177_s28 + $0x10] sm:$0xff]  ;;  %v813_v8 = vmov 128.0   ;;  %s1056_s6 = scalar_lea.vmem [#allocation7], %s570_s11 }
  0x2f   : > { %v208_v2 = vld [vmem:[%s177_s28] sm:$0xff]  ;;  %224 = vadd.xlane.f32.xlu2 %v212_v0  ;;  %220 = vadd.xlane.f32.xlu1 %v210_v1  ;;  %v213_v3 = vld [vmem:[%s177_s28 + $0x28] sm:$0xff]  ;;  %v211_v4 = vld [vmem:[%s177_s28 + $0x18] sm:$0xff]  ;;  %644 = vrcp.f32 %v813_v8  ;;  %s579_s17 = sshll.u32 %s857_s16, 6  ;;  %s476_s16 = sshll.u32 %s1056_s6, 4  ;;  %s477_s16 = int_to_ptr.vmem [resolvable:$true] %s476_s16 }
  0x30   : > { %216 = vadd.xlane.f32.xlu0 %v208_v2  ;;  %v209_v5 = vld [vmem:[%s177_s28 + $0x8] sm:$0xff]  ;;  %v215_v6 = vld [vmem:[%s177_s28 + $0x38] sm:$0xff]  ;;  %v214_v7 = vld [vmem:[%s177_s28 + $0x30] sm:$0xff]  ;;  %s475_s22 = scalar_lea.hbm %s1126_s3, %s579_s17  ;;  %s464_s30 = scalar_lea.sflag [#allocation4], %s933_s10 }
  0x31   : > { %s478_s29 = sshll.u32 %s475_s22, 4  ;;  %s758_s7 = scalar_lea.hbm %s1126_s3, 128  ;;  %s479_s29 = int_to_ptr.hbm [resolvable:$true] %s478_s29 }
  0x32   : > { %s752_s4 = sshra.s32 %s479_s29, 4  ;;  %s753_s4 = int_to_ptr.hbm [resolvable:$true] %s752_s4 }
  0x33   : > { %s754_s9 = scalar_lea.hbm %s753_s4, 64  ;;  %p759_p0 = scmp.lt.s32.totalorder %s753_s4, %s1126_s3 }
  0x34   : > { %p755_p4 = scmp.ne.s32.totalorder %s753_s4, %s754_s9  ;;  %p760_p7 = scmp.lt.s32.totalorder %s758_s7, %s754_s9 }
  0x35   : > { %v645_v9 = vpop.eup %644 }
  0x36   : > { %v233_v10 = vmul.f32 128.0, %v645_v9  ;;  %vm237_vm0 = vweird.f32 %v645_v9  ;;  %p756_p6 = pnand %p755_p4, %p888_p11  ;;  %p761_p5 = por %p760_p7, %p759_p0 }
  0x37   : > { %226 = vadd.xlane.f32.xlu2 %v213_v3  ;;  %222 = vadd.xlane.f32.xlu1 %v211_v4 }
  0x38   : > { %218 = vadd.xlane.f32.xlu0 %v209_v5  ;;  %v234_v11 = vsub.f32 1.0, %v233_v10  ;;  %p757_p13 = pneg %p756_p6 }
  0x3a   : > { %v235_v12 = vmul.f32 %v645_v9, %v234_v11  ;;  %p762_p8 = pnand %p761_p5, %p757_p13 }
  0x3c   : > { %v236_v13 = vadd.f32 %v645_v9, %v235_v12 }
  0x3e   : > { %v238_v14 = vsel %vm237_vm0, %v645_v9, %v236_v13 }
  0x3f   : > { %230 = vadd.xlane.f32.xlu1 %v215_v6 }
  0x40   : > { %228 = vadd.xlane.f32.xlu0 %v214_v7 }
  0xa2   : > { %v225_v15 = vpop.xlane.xlu2 %224  ;;  %v221_v16 = vpop.xlane.xlu1 %220 }
  0xa3   : > { %v241_v17 = vmul.f32 %v238_v14, %v221_v16  ;;  %v217_v18 = vpop.xlane.xlu0 %216  ;;  %v243_v32 = vmul.f32 %v238_v14, %v225_v15 }
  0xa4   : > { %v239_v19 = vmul.f32 %v238_v14, %v217_v18 }
  0xa5   : > { %v947_v20 = vsub.f32 %v210_v1, %v241_v17  ;;  %v967_v37 = vsub.f32 %v212_v0, %v243_v32 }
  0xa6   : > { %v949_v21 = vsub.f32 %v208_v2, %v239_v19 }
  0xa7   : > { %v257_v22 = vmul.f32 %v947_v20, %v947_v20  ;;  %v259_v42 = vmul.f32 %v967_v37, %v967_v37 }
  0xa8   : > { %v255_v23 = vmul.f32 %v949_v21, %v949_v21 }
  0xa9   : > { %267 = vadd.xlane.f32.xlu1 %v257_v22 }
  0xaa   : > { %263 = vadd.xlane.f32.xlu2 %v255_v23  ;;  %v227_v24 = vpop.xlane.xlu2 %226  ;;  %v223_v25 = vpop.xlane.xlu1 %222 }
  0xab   : > { %v244_v26 = vmul.f32 %v238_v14, %v227_v24  ;;  %v242_v27 = vmul.f32 %v238_v14, %v223_v25  ;;  %v219_v28 = vpop.xlane.xlu0 %218 }
  0xac   : > { %v240_v29 = vmul.f32 %v238_v14, %v219_v28 }
  0xad   : > { %v955_v30 = vsub.f32 %v213_v3, %v244_v26  ;;  %v957_v31 = vsub.f32 %v211_v4, %v242_v27 }
  0xae   : > { %v959_v33 = vsub.f32 %v209_v5, %v240_v29 }
  0xaf   : > { %v260_v34 = vmul.f32 %v955_v30, %v955_v30  ;;  %v258_v35 = vmul.f32 %v957_v31, %v957_v31 }
  0xb0   : > { %v256_v36 = vmul.f32 %v959_v33, %v959_v33 }
  0xb1   : > { %273 = vadd.xlane.f32.xlu1 %v260_v34 }
  0xb2   : > { %269 = vadd.xlane.f32.xlu2 %v258_v35  ;;  %265 = vadd.xlane.f32.xlu0 %v256_v36  ;;  %v231_v39 = vpop.xlane.xlu1 %230 }
  0xb3   : > { %v229_v38 = vpop.xlane.xlu0 %228  ;;  %v246_v43 = vmul.f32 %v238_v14, %v231_v39 }
  0xb4   : > { %v245_v40 = vmul.f32 %v238_v14, %v229_v38 }
  0xb5   : > { %v975_v45 = vsub.f32 %v215_v6, %v246_v43 }
  0xb6   : > { %v969_v41 = vsub.f32 %v214_v7, %v245_v40 }
  0xb7   : > { %v262_v46 = vmul.f32 %v975_v45, %v975_v45 }
  0xb8   : > { %v261_v44 = vmul.f32 %v969_v41, %v969_v41 }
  0xba   : > { %271 = vadd.xlane.f32.xlu0 %v259_v42  ;;  %275 = vadd.xlane.f32.xlu2 %v261_v44 }
  0xc2   : > { %277 = vadd.xlane.f32.xlu0 %v262_v46 }
 0x11c   : > { %v268_v47 = vpop.xlane.xlu1 %267 }
 0x11d   : > { %v281_v48 = vmul.f32 0.007874016, %v268_v47  ;;  %v264_v49 = vpop.xlane.xlu2 %263 }
 0x11e   : > { %v279_v50 = vmul.f32 0.007874016, %v264_v49 }
 0x11f   : > { %646 = vrsqrt.f32 %v281_v48  ;;  %vm318_vm1 = vcmp.eq.f32.partialorder %v281_v48, inf  ;;  %vm320_vm2 = vcmp.eq.f32.partialorder %v281_v48, 0.0  ;;  %v321_v8 = vand.u32 2147483648, %v281_v48 }
 0x120   : > { %648 = vrsqrt.f32 %v279_v50  ;;  %vm294_vm3 = vcmp.eq.f32.partialorder %v279_v50, inf  ;;  %vm296_vm4 = vcmp.eq.f32.partialorder %v279_v50, 0.0  ;;  %v297_v19 = vand.u32 2147483648, %v279_v50 }
 0x124   : > { %v274_v51 = vpop.xlane.xlu1 %273 }
 0x125   : > { %v647_v52 = vpop.eup %646  ;;  %v979_v53 = vmul.f32 0.007874016, %v274_v51  ;;  %v270_v54 = vpop.xlane.xlu2 %269 }
 0x126   : > { %v266_v55 = vpop.xlane.xlu0 %265  ;;  %v649_v56 = vpop.eup %648  ;;  %v312_v57 = vmul.f32 %v647_v52, %v281_v48  ;;  %v981_v58 = vmul.f32 0.007874016, %v270_v54 }
 0x127   : > { %v983_v59 = vmul.f32 0.007874016, %v266_v55  ;;  %v288_v60 = vmul.f32 %v649_v56, %v279_v50  ;;  %650 = vrsqrt.f32 %v979_v53  ;;  %vm354_vm5 = vcmp.eq.f32.partialorder %v979_v53, inf }
 0x128   : > { %v313_v61 = vmul.f32 %v647_v52, %v312_v57  ;;  %652 = vrsqrt.f32 %v981_v58  ;;  %vm356_vm6 = vcmp.eq.f32.partialorder %v979_v53, 0.0  ;;  %v357_v38 = vand.u32 2147483648, %v979_v53 }
 0x129   : > { %v289_v62 = vmul.f32 %v649_v56, %v288_v60  ;;  %654 = vrsqrt.f32 %v983_v59  ;;  %vm330_vm7 = vcmp.eq.f32.partialorder %v981_v58, inf  ;;  %vm332_vm8 = vcmp.eq.f32.partialorder %v981_v58, 0.0 }
 0x12a   : > { %v314_v63 = vmul.f32 0.5, %v313_v61  ;;  %vm306_vm9 = vcmp.eq.f32.partialorder %v983_v59, inf  ;;  %vm308_vm10 = vcmp.eq.f32.partialorder %v983_v59, 0.0 }
 0x12b   : > { %v290_v0 = vmul.f32 0.5, %v289_v62 }
 0x12c   : > { %v315_v1 = vsub.f32 1.5, %v314_v63  ;;  %v309_v63 = vand.u32 2147483648, %v983_v59 }
 0x12d   : > { %v651_v2 = vpop.eup %650  ;;  %v291_v3 = vsub.f32 1.5, %v290_v0  ;;  %v276_v4 = vpop.xlane.xlu2 %275 }
 0x12e   : > { %v272_v5 = vpop.xlane.xlu0 %271  ;;  %v653_v6 = vpop.eup %652  ;;  %v316_v7 = vmul.f32 %v647_v52, %v315_v1  ;;  %v348_v9 = vmul.f32 %v651_v2, %v979_v53  ;;  %v989_v10 = vmul.f32 0.007874016, %v276_v4 }
 0x12f   : > { %v655_v11 = vpop.eup %654  ;;  %v292_v12 = vmul.f32 %v649_v56, %v291_v3  ;;  %v324_v13 = vmul.f32 %v653_v6, %v981_v58  ;;  %v992_v14 = vmul.f32 0.007874016, %v272_v5 }
 0x130   : > { %v317_v15 = vmul.f32 %v316_v7, %v281_v48  ;;  %v349_v16 = vmul.f32 %v651_v2, %v348_v9  ;;  %v300_v17 = vmul.f32 %v655_v11, %v983_v59  ;;  %656 = vrsqrt.f32 %v989_v10 }
 0x131   : > { %v293_v18 = vmul.f32 %v292_v12, %v279_v50  ;;  %v325_v22 = vmul.f32 %v653_v6, %v324_v13  ;;  %658 = vrsqrt.f32 %v992_v14  ;;  %vm366_vm11 = vcmp.eq.f32.partialorder %v989_v10, inf }
 0x132   : > { %v319_v23 = vsel %vm318_vm1, %v281_v48, %v317_v15  ;;  %v350_v24 = vmul.f32 0.5, %v349_v16  ;;  %v301_v25 = vmul.f32 %v655_v11, %v300_v17  ;;  %vm368_vm12 = vcmp.eq.f32.partialorder %v989_v10, 0.0 }
 0x133   : > { %v322_v26 = vsel %vm320_vm2, %v321_v8, %v319_v23  ;;  %v295_v27 = vsel %vm294_vm3, %v279_v50, %v293_v18  ;;  %v326_v28 = vmul.f32 0.5, %v325_v22  ;;  %v333_v50 = vand.u32 2147483648, %v981_v58 }
 0x134   : > { %v385_v29 = vadd.f32 1e-05, %v322_v26  ;;  %v298_v32 = vsel %vm296_vm4, %v297_v19, %v295_v27  ;;  %v351_v34 = vsub.f32 1.5, %v350_v24  ;;  %v302_v35 = vmul.f32 0.5, %v301_v25 }
 0x135   : > { %v383_v36 = vadd.f32 1e-05, %v298_v32  ;;  %v327_v39 = vsub.f32 1.5, %v326_v28  ;;  %v369_v25 = vand.u32 2147483648, %v989_v10  ;;  %v1038_v28 = vld [vmem:[%s1125_s2] ss:$0 sm:$0xff] }
 0x136   : > { %v278_v40 = vpop.xlane.xlu0 %277  ;;  %v657_v42 = vpop.eup %656  ;;  %660 = vrcp.f32 %v385_v29  ;;  %v352_v43 = vmul.f32 %v651_v2, %v351_v34  ;;  %v303_v44 = vsub.f32 1.5, %v302_v35  ;;  %vm342_vm13 = vcmp.eq.f32.partialorder %v992_v14, inf }
 0x137   : > { %662 = vrcp.f32 %v383_v36  ;;  %v328_v46 = vmul.f32 %v653_v6, %v327_v39  ;;  %v360_v47 = vmul.f32 %v657_v42, %v989_v10  ;;  %v1005_v48 = vmul.f32 0.007874016, %v278_v40  ;;  %v659_v52 = vpop.eup %658 }
 0x138   : > { %v353_v49 = vmul.f32 %v352_v43, %v979_v53  ;;  %v304_v51 = vmul.f32 %v655_v11, %v303_v44  ;;  %v336_v60 = vmul.f32 %v659_v52, %v992_v14  ;;  %vm344_vm14 = vcmp.eq.f32.partialorder %v992_v14, 0.0 }
 0x139   : > { %v329_v54 = vmul.f32 %v328_v46, %v981_v58  ;;  %v361_v55 = vmul.f32 %v657_v42, %v360_v47  ;;  %664 = vrsqrt.f32 %v1005_v48  ;;  %vm378_vm15 = vcmp.eq.f32.partialorder %v1005_v48, inf }
 0x13a   : > { %v355_v56 = vsel %vm354_vm5, %v979_v53, %v353_v49  ;;  %v305_v57 = vmul.f32 %v304_v51, %v983_v59  ;;  %v337_v5 = vmul.f32 %v659_v52, %v336_v60  ;;  %vm380_vm0 = vcmp.eq.f32.partialorder %v1005_v48, 0.0 }
 0x13b   : > { %v358_v61 = vsel %vm356_vm6, %v357_v38, %v355_v56  ;;  %v331_v62 = vsel %vm330_vm7, %v981_v58, %v329_v54  ;;  %v362_v0 = vmul.f32 0.5, %v361_v55 }
 0x13c   : > { %v661_v1 = vpop.eup %660  ;;  %v388_v2 = vadd.f32 1e-05, %v358_v61  ;;  %v334_v3 = vsel %vm332_vm8, %v333_v50, %v331_v62  ;;  %v307_v4 = vsel %vm306_vm9, %v983_v59, %v305_v57  ;;  %v338_v13 = vmul.f32 0.5, %v337_v5  ;;  %v1029_v59 = vld [vmem:[#allocation5] ss:$0 sm:$0xff] }
 0x13d   : > { %v663_v6 = vpop.eup %662  ;;  %v401_v7 = vmul.f32 %v661_v1, %v385_v29  ;;  %v386_v8 = vadd.f32 1e-05, %v334_v3  ;;  %v310_v53 = vsel %vm308_vm10, %v309_v63, %v307_v4  ;;  %v363_v9 = vsub.f32 1.5, %v362_v0 }
 0x13e   : > { %v399_v11 = vmul.f32 %v663_v6, %v383_v36  ;;  %666 = vrcp.f32 %v388_v2  ;;  %v384_v12 = vadd.f32 1e-05, %v310_v53  ;;  %v339_v58 = vsub.f32 1.5, %v338_v13 }
 0x13f   : > { %v665_v15 = vpop.eup %664  ;;  %v409_v16 = vsub.f32 2.0, %v401_v7  ;;  %668 = vrcp.f32 %v386_v8  ;;  %v364_v17 = vmul.f32 %v657_v42, %v363_v9 }
 0x140   : > { %v407_v18 = vsub.f32 2.0, %v399_v11  ;;  %670 = vrcp.f32 %v384_v12  ;;  %v372_v19 = vmul.f32 %v665_v15, %v1005_v48  ;;  %v340_v26 = vmul.f32 %v659_v52, %v339_v58 }
 0x141   : > { %v417_v22 = vmul.f32 %v661_v1, %v409_v16  ;;  %v365_v23 = vmul.f32 %v364_v17, %v989_v10 }
 0x142   : > { %v415_v24 = vmul.f32 %v663_v6, %v407_v18  ;;  %v373_v27 = vmul.f32 %v665_v15, %v372_v19  ;;  %v341_v38 = vmul.f32 %v340_v26, %v992_v14 }
 0x143   : > { %v426_v29 = vmul.f32 %v417_v22, %v947_v20  ;;  %v367_v32 = vsel %vm366_vm11, %v989_v10, %v365_v23  ;;  %v345_v20 = vand.u32 2147483648, %v992_v14 }
 0x144   : > { %v667_v34 = vpop.eup %666  ;;  %v424_v35 = vmul.f32 %v415_v24, %v949_v21  ;;  %v370_v36 = vsel %vm368_vm12, %v369_v25, %v367_v32  ;;  %v374_v39 = vmul.f32 0.5, %v373_v27  ;;  %v343_v49 = vsel %vm342_vm13, %v992_v14, %v341_v38 }
 0x145   : > { %v669_v40 = vpop.eup %668  ;;  %v437_v42 = vmul.f32 %v1029_v59, %v426_v29  ;;  %v404_v43 = vmul.f32 %v667_v34, %v388_v2  ;;  %v389_v44 = vadd.f32 1e-05, %v370_v36  ;;  %v346_v56 = vsel %vm344_vm14, %v345_v20, %v343_v49 }
 0x146   : > { %v671_v10 = vpop.eup %670  ;;  %v435_v46 = vmul.f32 %v1029_v59, %v424_v35  ;;  %v402_v47 = vmul.f32 %v669_v40, %v386_v8  ;;  %v375_v50 = vsub.f32 1.5, %v374_v39  ;;  %v387_v62 = vadd.f32 1e-05, %v346_v56 }
 0x147   : > { %v449_v21 = vadd.f32 %v1038_v28, %v437_v42  ;;  %v412_v51 = vsub.f32 2.0, %v404_v43  ;;  %v400_v52 = vmul.f32 %v671_v10, %v384_v12  ;;  %672 = vrcp.f32 %v389_v44 }
 0x148   : > { %v447_v54 = vadd.f32 %v1038_v28, %v435_v46  ;;  %v410_v55 = vsub.f32 2.0, %v402_v47  ;;  %v376_v57 = vmul.f32 %v665_v15, %v375_v50  ;;  %674 = vrcp.f32 %v387_v62 }
 0x149   : > { %457 = vst [vmem:[%s1056_s6 + $0x10] sm:$0xff] %v449_v21  ;;  %v420_v60 = vmul.f32 %v667_v34, %v412_v51  ;;  %v408_v61 = vsub.f32 2.0, %v400_v52  ;;  %v381_v2 = vand.u32 2147483648, %v1005_v48 }
 0x14a   : > { %455 = vst [vmem:[%s1056_s6] sm:$0xff] %v447_v54  ;;  %v418_v63 = vmul.f32 %v669_v40, %v410_v55  ;;  %v377_v0 = vmul.f32 %v376_v57, %v1005_v48 }
 0x14b   : > { %v429_v1 = vmul.f32 %v420_v60, %v955_v30  ;;  %v416_v14 = vmul.f32 %v671_v10, %v408_v61 }
 0x14c   : > { %v427_v3 = vmul.f32 %v418_v63, %v957_v31  ;;  %v379_v4 = vsel %vm378_vm15, %v1005_v48, %v377_v0 }
 0x14d   : > { %v673_v5 = vpop.eup %672  ;;  %v440_v6 = vmul.f32 %v1029_v59, %v429_v1  ;;  %v425_v7 = vmul.f32 %v416_v14, %v959_v33  ;;  %v382_v8 = vsel %vm380_vm0, %v381_v2, %v379_v4 }
 0x14e   : > { %v438_v30 = vmul.f32 %v1029_v59, %v427_v3  ;;  %v405_v53 = vmul.f32 %v673_v5, %v389_v44  ;;  %v390_v9 = vadd.f32 1e-05, %v382_v8  ;;  %v675_v13 = vpop.eup %674 }
 0x14f   : > { %v452_v11 = vadd.f32 %v1038_v28, %v440_v6  ;;  %v436_v31 = vmul.f32 %v1029_v59, %v425_v7  ;;  %v403_v16 = vmul.f32 %v675_v13, %v387_v62 }
 0x150   : > { %v450_v12 = vadd.f32 %v1038_v28, %v438_v30  ;;  %v413_v48 = vsub.f32 2.0, %v405_v53  ;;  %676 = vrcp.f32 %v390_v9 }
 0x151   : > { %460 = vst [vmem:[%s1056_s6 + $0x28] sm:$0xff] %v452_v11  ;;  %v448_v33 = vadd.f32 %v1038_v28, %v436_v31  ;;  %v411_v18 = vsub.f32 2.0, %v403_v16 }
 0x152   : > { %458 = vst [vmem:[%s1056_s6 + $0x18] sm:$0xff] %v450_v12  ;;  %v421_v15 = vmul.f32 %v673_v5, %v413_v48 }
 0x153   : > { %456 = vst [vmem:[%s1056_s6 + $0x8] sm:$0xff] %v448_v33  ;;  %v419_v22 = vmul.f32 %v675_v13, %v411_v18 }
 0x154   : > { %v430_v17 = vmul.f32 %v421_v15, %v969_v41 }
 0x155   : > { %v428_v25 = vmul.f32 %v419_v22, %v967_v37 }
 0x156   : > { %v677_v58 = vpop.eup %676  ;;  %v441_v19 = vmul.f32 %v1029_v59, %v430_v17 }
 0x157   : > { %v406_v23 = vmul.f32 %v677_v58, %v390_v9  ;;  %v439_v27 = vmul.f32 %v1029_v59, %v428_v25 }
 0x158   : > { %v453_v24 = vadd.f32 %v1038_v28, %v441_v19 }
 0x159   : > { %v414_v26 = vsub.f32 2.0, %v406_v23  ;;  %v451_v29 = vadd.f32 %v1038_v28, %v439_v27 }
 0x15a   : > { %461 = vst [vmem:[%s1056_s6 + $0x30] sm:$0xff] %v453_v24 }
 0x15b   : > { %v422_v41 = vmul.f32 %v677_v58, %v414_v26  ;;  %459 = vst [vmem:[%s1056_s6 + $0x20] sm:$0xff] %v451_v29 }
 0x15d   : > { %v431_v32 = vmul.f32 %v422_v41, %v975_v45 }
 0x15f   : > { %v442_v37 = vmul.f32 %v1029_v59, %v431_v32 }
 0x161   : > { %v454_v34 = vadd.f32 %v1038_v28, %v442_v37 }
 0x163   : > { %462 = vst [vmem:[%s1056_s6 + $0x38] sm:$0xff] %v454_v34 }
 0x164   : > { %765 = shalt.err (!%p762_p8)
}
 0x165   : > { %s814_s10 = smov 128   ;;  %s815_s28 = smov 8  }
 0x166   : > { %586 = dma.vmem_to_hbm [thread:$0]  (%p888_p11), %s477_s16, 1024, %s479_s29, %s464_s30, %s814_s10, %s814_s10, %s815_s28  }
 0x167 PF: > { %s493_s23 = sand.u32 1, %s796_s12   ;;  %p1133_p9 = scmp.ge.s32.totalorder %s808_s15, 2 }
 0x168   : > { %s494_s26 = scalar_lea.sflag [#allocation4], %s493_s23 }
 0x169   : > { %p597_p10 = pnand %p1133_p9, %p892_p12 }
 0x16b   : > { %p598_p1 = pneg %p597_p10 }
 0x16d   : > { %791 = dma.done.wait (%p598_p1), %s494_s26, 1024  }
 0x16e   : > { %793 = vsyncadd (%p598_p1), %s494_s26, 4294966272  ;;  %p17_p2 = scmp.ge.s32.totalorder %s861_s18, 4   ;;  %s1134_s12 = smov %s800_s13 }
 0x16f   : > { %s1135_s13 = smov %s804_s14  ;;  %s1136_s14 = smov %s873_s21 }
 0x170   : > { %s1137_s15 = smov %s861_s18  ;;  %19 = sbr.rel (!%p17_p2) target bundleno = 6 (0x6), region = 81 }
 0x175   :  { %500 = vsyncpa [#allocation3], 1 }
 0x176   :  { %502 = vsyncpa [#allocation3 + $0x1], 1 }
 0x177   :  { %503 = vsyncpa [#allocation6], 1 }
 0x178   :  { %504 = vsyncpa [#allocation4], 1 }
 0x179   :  { %506 = vsyncpa [#allocation4 + $0x1], 1 }

</bundles_post_ra>
